<compile_context>
chip_gen: v7x
topology: tpu7x:2x2x1
jax: 0.10.0
libtpu: 0.0.40
codegen_flags: <defaults>
</compile_context>

<pallas_src>
import functools
import math

import jax
import jax.numpy as jnp
from jax.experimental import pallas as pl
from jax.experimental.pallas import tpu as pltpu

_LANE = 128          # f32/bf16 lane width
_BF16_SUBLANE = 16   # bf16 sublane packing; batch tiles padded to this


def _round_up(x, m):
    return ((x + m - 1) // m) * m


# --------------------------- Pallas kernel (hot path) ---------------------------
def _ram_kernel(cfg, x_ref, w_ref, b_ref, o_ref):
    """One fused RAM step on lane-dense slabs.

    x lane layout : [h_prev | noise | loc | phi | 0]   (noise at lanes [h, h+2))
    o lane layout : [h | l_t | b_t | log_pi | log_probas | 0]
    w row  layout : [wgl(in_w) ; whh(in_w) ; www(128) ; win(128) ; whd(128)]
    b row  layout : [bgl ; bww ; brnn ; bhd ; 0 x4]    ([8, 128] f32)
    """
    in_w, h, nc, std = cfg
    f32, bf16 = jnp.float32, jnp.bfloat16
    W = o_ref.shape[1]                        # 128 (lane-dense output slab)

    x = x_ref[...]                            # [bt, in_w] f32
    xb = x.astype(bf16)

    r = 0
    wgl = w_ref[r:r + in_w, :]; r += in_w     # [phi|loc] rows -> [g1|l1] cols
    whh = w_ref[r:r + in_w, :]; r += in_w     # h_prev rows    -> h cols (recurrent)
    www = w_ref[r:r + W, :]; r += W           # [g1|l1]        -> g_t (what+where)
    win = w_ref[r:r + W, :]; r += W           # g_t            -> h (input)
    whd = w_ref[r:r + W, :]                   # h -> [ . | mu | base | 0 | logits | 0]

    bgl = b_ref[0:1, :]
    bww = b_ref[1:2, :]
    brnn = b_ref[2:3, :]
    bhd = b_ref[3:4, :]

    # Recurrent contribution: independent of the glimpse chain -> overlaps with
    # the first two dependent matmuls.
    hh = jnp.dot(xb, whh, preferred_element_type=f32)

    # GlimpseNet stage 1 (zero-padded weight rows: full-slab dot, no lane slicing)
    gl = jnp.maximum(jnp.dot(xb, wgl, preferred_element_type=f32) + bgl, 0.0)
    # GlimpseNet stage 2 (what + where fused)
    g_t = jnp.maximum(
        jnp.dot(gl.astype(bf16), www, preferred_element_type=f32) + bww, 0.0)
    # RNN core: relu(g_t @ win + h_prev @ whh + bin + bhh); lanes [h,128) exact 0
    h_cur = jnp.maximum(
        jnp.dot(g_t.astype(bf16), win, preferred_element_type=f32) + hh + brnn, 0.0)
    # Fused heads, emitted straight into their output-lane positions by the MXU
    head = jnp.dot(h_cur.astype(bf16), whd, preferred_element_type=f32) + bhd

    bt = x.shape[0]
    lane = jax.lax.broadcasted_iota(jnp.int32, (bt, W), 1)
    is_mu = (lane >= h) & (lane < h + 2)
    is_base = lane == h + 2
    is_logpi = lane == h + 3
    is_logits = (lane >= h + 4) & (lane < h + 4 + nc)

    # first lane-tile of x carries the reparam noise at lanes [h, h+2)
    x_lo = x if in_w == W else x[:, :W]

    # location head (whole-vreg EUP/VPU ops, lane-masked at assembly time)
    mu = jnp.tanh(head)
    l_t = jnp.clip(mu + std * x_lo, -1.0, 1.0)

    # log_pi = sum over the two loc lanes of Normal(mu, std).log_prob(l_t)
    z = (l_t - mu) * (1.0 / std)
    norm_const = math.log(std) + 0.5 * math.log(2.0 * math.pi)
    log_pi = jnp.sum(jnp.where(is_mu, -0.5 * z * z - norm_const, 0.0),
                     axis=1, keepdims=True)                     # [bt, 1]

    # lane-masked, max-subtracted log_softmax over the logits lanes
    lmask = jnp.where(is_logits, head, -jnp.inf)
    m = jnp.max(lmask, axis=1, keepdims=True)
    lse = jnp.log(jnp.sum(jnp.exp(lmask - m), axis=1, keepdims=True)) + m
    logp = head - lse

    # assemble the output slab with vreg selects (no concatenate / lane shifts),
    # then a single unmasked lane-dense store.
    out = h_cur                               # lanes [0,h) = hidden, rest zeros
    out = jnp.where(is_mu, l_t, out)
    out = jnp.where(is_base, jnp.maximum(head, 0.0), out)
    out = jnp.where(is_logpi, log_pi, out)
    out = jnp.where(is_logits, logp, out)
    o_ref[...] = out


# ------------------------------- JAX glue ---------------------------------------
def extract_glimpses(images, loc, window_size, num_glimpses):
    """Multi-scale retina: crop patches of size ws*2^k at `loc`, avg-pool each
    down to ws x ws, flatten and concatenate.  images: [B, C, H, W] NCHW.
    # TODO(synk): data-dependent gather + avg-pool kept in plain JAX; could move
    # in-kernel via scalar-prefetch coords + pltpu.make_async_copy.
    """
    B, C, H, W = images.shape
    max_size = window_size * (2 ** (num_glimpses - 1))
    pad = max_size // 2 + 1
    padded = jnp.pad(images, ((0, 0), (0, 0), (pad, pad), (pad, pad)))
    # denormalize [-1, 1] -> pixel coords
    coords = 0.5 * ((loc + 1.0) * jnp.array([H, W], dtype=jnp.float32))

    parts = []
    for k in range(num_glimpses):
        size = window_size * (2 ** k)

        def crop_one(img, c, size=size):
            sh = jnp.clip(jnp.round(c[0]).astype(jnp.int32) - size // 2 + pad,
                          0, H + 2 * pad - size)
            sw = jnp.clip(jnp.round(c[1]).astype(jnp.int32) - size // 2 + pad,
                          0, W + 2 * pad - size)
            return jax.lax.dynamic_slice(img, (0, sh, sw), (C, size, size))

        patch = jax.vmap(crop_one)(padded, coords)          # [B, C, size, size]
        f = size // window_size
        patch = patch.reshape(B, C, window_size, f, window_size, f).mean(axis=(3, 5))
        parts.append(patch.reshape(B, -1))
    return jnp.concatenate(parts, axis=1)                    # [B, ng*C*ws*ws]


def init_params(key, window_size, num_glimpses, h_image, h_loc, h_hidden, num_classes):
    gdim = window_size * window_size * num_glimpses

    def linear(k, fan_in, fan_out):
        kw, kb = jax.random.split(k)
        bound = 1.0 / math.sqrt(fan_in)
        w = jax.random.uniform(kw, (fan_in, fan_out), jnp.float32, -bound, bound)
        b = jax.random.uniform(kb, (1, fan_out), jnp.float32, -bound, bound)
        return w, b

    keys = jax.random.split(key, 9)
    p = {}
    p["wg1"], p["bg1"] = linear(keys[0], gdim, h_image)            # glimpse: image fc
    p["wg2"], p["bg2"] = linear(keys[1], 2, h_loc)                 # glimpse: loc fc
    p["wg3"], p["bg3"] = linear(keys[2], h_image, h_image + h_loc) # glimpse: what
    p["wg4"], p["bg4"] = linear(keys[3], h_loc, h_image + h_loc)   # glimpse: where
    p["win"], p["bin"] = linear(keys[4], h_image + h_loc, h_hidden)
    p["whh"], p["bhh"] = linear(keys[5], h_hidden, h_hidden)
    p["wloc"], p["bloc"] = linear(keys[6], h_hidden, 2)
    p["wbase"], p["bbase"] = linear(keys[7], h_hidden, 1)
    p["wact"], p["bact"] = linear(keys[8], h_hidden, num_classes)
    return p


def pack_params(params, *, gdim, h_image, h_loc, h_hidden, num_classes):
    """Fuse + zero-pad all weights ONCE into a single bf16 slab and a single f32
    bias slab, laid out for the kernel's input/output lane layouts.  The padding
    lanes of the activation slab always multiply exactly-zero weight rows."""
    f32, bf16 = jnp.float32, jnp.bfloat16
    h = h_hidden
    gg = h_image + h_loc
    W = _LANE
    assert gg <= W and h + 4 + num_classes <= W
    in_used = h + 4 + gdim
    in_w = _round_up(in_used, W)
    off_loc, off_phi = h + 2, h + 4            # lane offsets inside the x slab

    wgl = jnp.zeros((in_w, W), f32)            # [phi|loc] -> [g1|l1]
    wgl = wgl.at[off_phi:off_phi + gdim, 0:h_image].set(params["wg1"])
    wgl = wgl.at[off_loc:off_loc + 2, h_image:gg].set(params["wg2"])

    whh = jnp.zeros((in_w, W), f32)            # h_prev -> h (recurrent)
    whh = whh.at[0:h, 0:h].set(params["whh"])

    www = jnp.zeros((W, W), f32)               # [g1|l1] -> g_t (what + where)
    www = www.at[0:h_image, 0:gg].set(params["wg3"])
    www = www.at[h_image:gg, 0:gg].set(params["wg4"])

    win = jnp.zeros((W, W), f32)               # g_t -> h (input)
    win = win.at[0:gg, 0:h].set(params["win"])

    whd = jnp.zeros((W, W), f32)               # h -> [ . | mu | base | 0 | logits | 0]
    whd = whd.at[0:h, h:h + 2].set(params["wloc"])
    whd = whd.at[0:h, h + 2:h + 3].set(params["wbase"])
    whd = whd.at[0:h, h + 4:h + 4 + num_classes].set(params["wact"])

    w_slab = jnp.concatenate([wgl, whh, www, win, whd], axis=0).astype(bf16)

    b = jnp.zeros((8, W), f32)
    b = b.at[0, 0:h_image].set(params["bg1"][0])
    b = b.at[0, h_image:gg].set(params["bg2"][0])
    b = b.at[1, 0:gg].set(params["bg3"][0] + params["bg4"][0])
    b = b.at[2, 0:h].set(params["bin"][0] + params["bhh"][0])
    b = b.at[3, h:h + 2].set(params["bloc"][0])
    b = b.at[3, h + 2].set(params["bbase"][0, 0])
    b = b.at[3, h + 4:h + 4 + num_classes].set(params["bact"][0])
    return {"w": w_slab, "b": b}


def recurrent_attention_forward(packed, batch_images, location, hidden_prev, noise,
                                *, window_size, num_glimpses, h_hidden, num_classes,
                                std_dev, last=True):
    B = batch_images.shape[0]
    h = h_hidden
    phi = extract_glimpses(batch_images, location, window_size, num_glimpses)
    gdim = phi.shape[1]

    out_w = _LANE
    assert h + 4 + num_classes <= out_w, "output slab must fit in one lane tile"
    in_used = h + 4 + gdim
    in_w = _round_up(in_used, _LANE)

    # batch tile: multiple of 16 (bf16 sublanes), large to amortize the ~0.35us
    # per-grid-step overhead, >=2 tiles when possible so the "parallel" batch
    # axis can shard across v7x's two TensorCores.
    b_min = _round_up(B, _BF16_SUBLANE)
    if b_min <= 32:
        b_tile = b_min
    else:
        b_tile = min(512, _round_up((b_min + 1) // 2, _BF16_SUBLANE))
    b_pad = _round_up(b_min, b_tile)

    # one lane-dense f32 input slab: [h_prev | noise | loc | phi | 0]
    # (noise is placed at lanes [h, h+2) so it lands on the mu head lanes)
    x = jnp.concatenate([hidden_prev, noise, location, phi], axis=1)
    x = jnp.pad(x, ((0, b_pad - B), (0, in_w - in_used)))

    w_slab, b_slab = packed["w"], packed["b"]
    assert w_slab.shape == (2 * in_w + 3 * out_w, out_w)

    # VMEM budget: double-buffered I/O + fused weights + generous room for the
    # whole-slab f32 temporaries (few MiB — do not blanket-reserve 32 MiB).
    x_bytes = b_tile * in_w * 4
    o_bytes = b_tile * out_w * 4
    w_bytes = int(w_slab.size) * 2
    bias_bytes = int(b_slab.size) * 4
    vmem_limit = int(2 * (x_bytes + o_bytes + w_bytes + bias_bytes)
                     + (6 * in_w + 16 * out_w) * b_tile * 4)
    vmem_limit = max(vmem_limit + (2 << 20), 4 << 20)

    cost = pl.CostEstimate(
        flops=2 * b_pad * int(w_slab.shape[0]) * int(w_slab.shape[1]),
        transcendentals=3 * b_pad * out_w,
        bytes_accessed=w_bytes + bias_bytes + b_pad * (in_w + out_w) * 4,
    )

    slab = pl.pallas_call(
        functools.partial(_ram_kernel, (in_w, h, num_classes, float(std_dev))),
        out_shape=jax.ShapeDtypeStruct((b_pad, out_w), jnp.float32),
        grid=(b_pad // b_tile,),
        in_specs=[
            pl.BlockSpec((b_tile, in_w), lambda i: (i, 0)),
            pl.BlockSpec(w_slab.shape, lambda i: (0, 0)),   # weights VMEM-resident
            pl.BlockSpec(b_slab.shape, lambda i: (0, 0)),
        ],
        out_specs=pl.BlockSpec((b_tile, out_w), lambda i: (i, 0)),
        compiler_params=pltpu.CompilerParams(
            dimension_semantics=("parallel",),              # shards batch tiles on v7x
            vmem_limit_bytes=vmem_limit),
        cost_estimate=cost,
    )(x, w_slab, b_slab)

    # ---- unpack + drop padded batch rows ----
    hidden = slab[:B, :h]
    l_t = slab[:B, h:h + 2]
    b_t = slab[:B, h + 2]                      # .squeeze() in torch forward
    log_pi = slab[:B, h + 3]                   # torch.sum(log_pi, dim=1)
    log_probas = slab[:B, h + 4:h + 4 + num_classes]

    if last:
        return hidden, l_t, b_t, log_probas, log_pi
    return hidden, l_t, b_t, log_pi


# ------------------------- pure-JAX reference (for checking) ---------------------
def _reference_forward(params, phi, location, noise, hidden_prev, *, std_dev):
    f32, bf16 = jnp.float32, jnp.bfloat16
    dot = lambda a, w: jnp.dot(a.astype(bf16), w.astype(bf16), preferred_element_type=f32)
    g1 = jax.nn.relu(dot(phi, params["wg1"]) + params["bg1"])
    l1 = jax.nn.relu(dot(location, params["wg2"]) + params["bg2"])
    what = dot(g1, params["wg3"]) + params["bg3"]
    where = dot(l1, params["wg4"]) + params["bg4"]
    g_t = jax.nn.relu(what + where)
    h = jax.nn.relu(dot(g_t, params["win"]) + params["bin"]
                    + dot(hidden_prev, params["whh"]) + params["bhh"])
    mu = jnp.tanh(dot(h, params["wloc"]) + params["bloc"])
    l_t = jnp.clip(mu + std_dev * noise, -1.0, 1.0)
    b_t = jax.nn.relu(dot(h, params["wbase"]) + params["bbase"])[:, 0]
    log_pi = jnp.sum(-0.5 * ((l_t - mu) / std_dev) ** 2
                     - math.log(std_dev) - 0.5 * math.log(2.0 * math.pi), axis=1)
    logits = dot(h, params["wact"]) + params["bact"]
    log_probas = jax.nn.log_softmax(logits, axis=1)
    return h, l_t, b_t, log_probas, log_pi


# ---------------------------------- main -----------------------------------------
if __name__ == "__main__":
    B, C, H, W = 2, 1, 16, 16
    window_size, num_glimpses = 4, 2
    h_image, h_loc, h_hidden = 32, 16, 32
    num_classes = 10
    std_dev = 0.2

    key = jax.random.PRNGKey(0)
    k_par, k_img, k_loc, k_noise = jax.random.split(key, 4)

    params = init_params(k_par, window_size, num_glimpses,
                         h_image, h_loc, h_hidden, num_classes)
    gdim = C * window_size * window_size * num_glimpses
    packed = pack_params(params, gdim=gdim, h_image=h_image, h_loc=h_loc,
                         h_hidden=h_hidden, num_classes=num_classes)

    batch_images = jax.random.normal(k_img, (B, C, H, W), jnp.float32)
    location = jax.random.uniform(k_loc, (B, 2), jnp.float32, -1.0, 1.0)
    hidden_prev = jnp.zeros((B, h_hidden), jnp.float32)
    noise = jax.random.normal(k_noise, (B, 2), jnp.float32)  # reparam sample noise

    outs = recurrent_attention_forward(
        packed, batch_images, location, hidden_prev, noise,
        window_size=window_size, num_glimpses=num_glimpses,
        h_hidden=h_hidden, num_classes=num_classes, std_dev=std_dev, last=True)
    outs = jax.block_until_ready(outs)
    hidden, l_t, b_t, log_probas, log_pi = outs

    assert hidden.shape == (B, h_hidden)
    assert l_t.shape == (B, 2)
    assert b_t.shape == (B,)
    assert log_probas.shape == (B, num_classes)
    assert log_pi.shape == (B,)

    # numerical check against an unfused pure-JAX reference (same bf16-operand /
    # f32-accumulate recipe); fusion + zero-padding must match within fp noise.
    phi = extract_glimpses(batch_images, location, window_size, num_glimpses)
    r_h, r_lt, r_bt, r_lp, r_pi = _reference_forward(
        params, phi, location, noise, hidden_prev, std_dev=std_dev)
    tol = dict(atol=5e-3, rtol=5e-3)
    assert jnp.allclose(hidden, r_h, **tol)
    assert jnp.allclose(l_t, r_lt, **tol)
    assert jnp.allclose(b_t, r_bt, **tol)
    assert jnp.allclose(log_probas, r_lp, **tol)
    assert jnp.allclose(log_pi, r_pi, **tol)

    print("KERNEL_OK")
</pallas_src>

<mosaic_0001>
module attributes {stable_mosaic.version = 11 : i64} {
  func.func @_ram_kernel(%arg0: i32, %arg1: memref<16x128xf32, #tpu.memory_space<vmem>>, %arg2: memref<640x128xbf16, #tpu.memory_space<vmem>>, %arg3: memref<8x128xf32, #tpu.memory_space<vmem>>, %arg4: memref<16x128xf32, #tpu.memory_space<vmem>>) attributes {dimension_semantics = [#tpu.dimension_semantics<parallel>], iteration_bounds = array<i64: 1>, scalar_prefetch = 0 : i64, scratch_operands = 0 : i64, tpu.core_type = #tpu.core_type<tc>, window_params = [{transform_indices = @transform_0, window_bounds = array<i64: 16, 128>}, {pipeline_mode = #tpu.pipeline_mode<synchronous>, transform_indices = @transform_1, window_bounds = array<i64: 640, 128>}, {pipeline_mode = #tpu.pipeline_mode<synchronous>, transform_indices = @transform_2, window_bounds = array<i64: 8, 128>}, {transform_indices = @transform_3, window_bounds = array<i64: 16, 128>}]} {
    %c0 = arith.constant 0 : index
    %c0_0 = arith.constant 0 : index
    %0 = vector.load %arg1[%c0, %c0_0] : memref<16x128xf32, #tpu.memory_space<vmem>>, vector<16x128xf32>
    %1 = arith.truncf %0 : vector<16x128xf32> to vector<16x128xbf16>
    %c0_1 = arith.constant 0 : index
    %c0_2 = arith.constant 0 : index
    %2 = vector.load %arg2[%c0_1, %c0_2] : memref<640x128xbf16, #tpu.memory_space<vmem>>, vector<128x128xbf16>
    %c128 = arith.constant 128 : index
    %c0_3 = arith.constant 0 : index
    %3 = vector.load %arg2[%c128, %c0_3] : memref<640x128xbf16, #tpu.memory_space<vmem>>, vector<128x128xbf16>
    %c256 = arith.constant 256 : index
    %c0_4 = arith.constant 0 : index
    %4 = vector.load %arg2[%c256, %c0_4] : memref<640x128xbf16, #tpu.memory_space<vmem>>, vector<128x128xbf16>
    %c384 = arith.constant 384 : index
    %c0_5 = arith.constant 0 : index
    %5 = vector.load %arg2[%c384, %c0_5] : memref<640x128xbf16, #tpu.memory_space<vmem>>, vector<128x128xbf16>
    %c512 = arith.constant 512 : index
    %c0_6 = arith.constant 0 : index
    %6 = vector.load %arg2[%c512, %c0_6] : memref<640x128xbf16, #tpu.memory_space<vmem>>, vector<128x128xbf16>
    %c0_7 = arith.constant 0 : index
    %c0_8 = arith.constant 0 : index
    %7 = vector.load %arg3[%c0_7, %c0_8] : memref<8x128xf32, #tpu.memory_space<vmem>>, vector<1x128xf32>
    %c1 = arith.constant 1 : index
    %c0_9 = arith.constant 0 : index
    %8 = vector.load %arg3[%c1, %c0_9] : memref<8x128xf32, #tpu.memory_space<vmem>>, vector<1x128xf32>
    %c2 = arith.constant 2 : index
    %c0_10 = arith.constant 0 : index
    %9 = vector.load %arg3[%c2, %c0_10] : memref<8x128xf32, #tpu.memory_space<vmem>>, vector<1x128xf32>
    %c3 = arith.constant 3 : index
    %c0_11 = arith.constant 0 : index
    %10 = vector.load %arg3[%c3, %c0_11] : memref<8x128xf32, #tpu.memory_space<vmem>>, vector<1x128xf32>
    %cst = arith.constant dense<0.000000e+00> : vector<16x128xf32>
    %11 = tpu.matmul %1, %3, %cst {dimension_numbers = #tpu.dot_dimension_numbers<[1], [0], [0], [1], [0, 0, 1, 1], [], []>} : vector<16x128xbf16>, vector<128x128xbf16>, vector<16x128xf32> -> vector<16x128xf32>
    %cst_12 = arith.constant dense<0.000000e+00> : vector<16x128xf32>
    %12 = tpu.matmul %1, %2, %cst_12 {dimension_numbers = #tpu.dot_dimension_numbers<[1], [0], [0], [1], [0, 0, 1, 1], [], []>} : vector<16x128xbf16>, vector<128x128xbf16>, vector<16x128xf32> -> vector<16x128xf32>
    %13 = vector.broadcast %7 : vector<1x128xf32> to vector<16x128xf32>
    %14 = arith.addf %12, %13 : vector<16x128xf32>
    %cst_13 = arith.constant 0.000000e+00 : f32
    %15 = vector.broadcast %cst_13 : f32 to vector<16x128xf32>
    %16 = arith.maximumf %14, %15 : vector<16x128xf32>
    %17 = arith.truncf %16 : vector<16x128xf32> to vector<16x128xbf16>
    %cst_14 = arith.constant dense<0.000000e+00> : vector<16x128xf32>
    %18 = tpu.matmul %17, %4, %cst_14 {dimension_numbers = #tpu.dot_dimension_numbers<[1], [0], [0], [1], [0, 0, 1, 1], [], []>} : vector<16x128xbf16>, vector<128x128xbf16>, vector<16x128xf32> -> vector<16x128xf32>
    %19 = vector.broadcast %8 : vector<1x128xf32> to vector<16x128xf32>
    %20 = arith.addf %18, %19 : vector<16x128xf32>
    %cst_15 = arith.constant 0.000000e+00 : f32
    %21 = vector.broadcast %cst_15 : f32 to vector<16x128xf32>
    %22 = arith.maximumf %20, %21 : vector<16x128xf32>
    %23 = arith.truncf %22 : vector<16x128xf32> to vector<16x128xbf16>
    %cst_16 = arith.constant dense<0.000000e+00> : vector<16x128xf32>
    %24 = tpu.matmul %23, %5, %cst_16 {dimension_numbers = #tpu.dot_dimension_numbers<[1], [0], [0], [1], [0, 0, 1, 1], [], []>} : vector<16x128xbf16>, vector<128x128xbf16>, vector<16x128xf32> -> vector<16x128xf32>
    %25 = arith.addf %24, %11 : vector<16x128xf32>
    %26 = vector.broadcast %9 : vector<1x128xf32> to vector<16x128xf32>
    %27 = arith.addf %25, %26 : vector<16x128xf32>
    %cst_17 = arith.constant 0.000000e+00 : f32
    %28 = vector.broadcast %cst_17 : f32 to vector<16x128xf32>
    %29 = arith.maximumf %27, %28 : vector<16x128xf32>
    %30 = arith.truncf %29 : vector<16x128xf32> to vector<16x128xbf16>
    %cst_18 = arith.constant dense<0.000000e+00> : vector<16x128xf32>
    %31 = tpu.matmul %30, %6, %cst_18 {dimension_numbers = #tpu.dot_dimension_numbers<[1], [0], [0], [1], [0, 0, 1, 1], [], []>} : vector<16x128xbf16>, vector<128x128xbf16>, vector<16x128xf32> -> vector<16x128xf32>
    %32 = vector.broadcast %10 : vector<1x128xf32> to vector<16x128xf32>
    %33 = arith.addf %31, %32 : vector<16x128xf32>
    %34 = tpu.iota {dimensions = array<i32: 1>} : vector<16x128xi32>
    %c32_i32 = arith.constant 32 : i32
    %35 = vector.broadcast %c32_i32 : i32 to vector<16x128xi32>
    %36 = arith.cmpi sge, %34, %35 : vector<16x128xi32>
    %c34_i32 = arith.constant 34 : i32
    %37 = vector.broadcast %c34_i32 : i32 to vector<16x128xi32>
    %38 = arith.cmpi slt, %34, %37 : vector<16x128xi32>
    %39 = arith.andi %36, %38 : vector<16x128xi1>
    %c34_i32_19 = arith.constant 34 : i32
    %40 = vector.broadcast %c34_i32_19 : i32 to vector<16x128xi32>
    %41 = arith.cmpi eq, %34, %40 : vector<16x128xi32>
    %c35_i32 = arith.constant 35 : i32
    %42 = vector.broadcast %c35_i32 : i32 to vector<16x128xi32>
    %43 = arith.cmpi eq, %34, %42 : vector<16x128xi32>
    %c36_i32 = arith.constant 36 : i32
    %44 = vector.broadcast %c36_i32 : i32 to vector<16x128xi32>
    %45 = arith.cmpi sge, %34, %44 : vector<16x128xi32>
    %c46_i32 = arith.constant 46 : i32
    %46 = vector.broadcast %c46_i32 : i32 to vector<16x128xi32>
    %47 = arith.cmpi slt, %34, %46 : vector<16x128xi32>
    %48 = arith.andi %45, %47 : vector<16x128xi1>
    %49 = math.tanh %33 : vector<16x128xf32>
    %cst_20 = arith.constant 2.000000e-01 : f32
    %50 = vector.broadcast %cst_20 : f32 to vector<16x128xf32>
    %51 = arith.mulf %50, %0 : vector<16x128xf32>
    %52 = arith.addf %49, %51 : vector<16x128xf32>
    %cst_21 = arith.constant -1.000000e+00 : f32
    %cst_22 = arith.constant 1.000000e+00 : f32
    %53 = vector.broadcast %cst_21 : f32 to vector<16x128xf32>
    %54 = arith.maximumf %53, %52 : vector<16x128xf32>
    %55 = vector.broadcast %cst_22 : f32 to vector<16x128xf32>
    %56 = arith.minimumf %55, %54 : vector<16x128xf32>
    %57 = arith.subf %56, %49 : vector<16x128xf32>
    %cst_23 = arith.constant 5.000000e+00 : f32
    %58 = vector.broadcast %cst_23 : f32 to vector<16x128xf32>
    %59 = arith.mulf %57, %58 : vector<16x128xf32>
    %cst_24 = arith.constant -5.000000e-01 : f32
    %60 = vector.broadcast %cst_24 : f32 to vector<16x128xf32>
    %61 = arith.mulf %60, %59 : vector<16x128xf32>
    %62 = arith.mulf %61, %59 : vector<16x128xf32>
    %cst_25 = arith.constant -0.690499365 : f32
    %63 = vector.broadcast %cst_25 : f32 to vector<16x128xf32>
    %64 = arith.subf %62, %63 : vector<16x128xf32>
    %cst_26 = arith.constant 0.000000e+00 : f32
    %65 = vector.broadcast %cst_26 : f32 to vector<16x128xf32>
    %66 = arith.select %39, %64, %65 : vector<16x128xi1>, vector<16x128xf32>
    %cst_27 = arith.constant dense<0.000000e+00> : vector<16xf32>
    %67 = vector.multi_reduction <add>, %66, %cst_27 [1] : vector<16x128xf32> to vector<16xf32>
    %68 = vector.shape_cast %67 : vector<16xf32> to vector<16x1xf32>
    %cst_28 = arith.constant 0xFF800000 : f32
    %69 = vector.broadcast %cst_28 : f32 to vector<16x128xf32>
    %70 = arith.select %48, %33, %69 : vector<16x128xi1>, vector<16x128xf32>
    %cst_29 = arith.constant dense<0xFF800000> : vector<16xf32>
    %71 = vector.multi_reduction <maximumf>, %70, %cst_29 [1] : vector<16x128xf32> to vector<16xf32>
    %72 = vector.shape_cast %71 : vector<16xf32> to vector<16x1xf32>
    %73 = vector.broadcast %72 : vector<16x1xf32> to vector<16x128xf32>
    %74 = arith.subf %70, %73 : vector<16x128xf32>
    %75 = math.exp %74 : vector<16x128xf32>
    %cst_30 = arith.constant dense<0.000000e+00> : vector<16xf32>
    %76 = vector.multi_reduction <add>, %75, %cst_30 [1] : vector<16x128xf32> to vector<16xf32>
    %77 = vector.shape_cast %76 : vector<16xf32> to vector<16x1xf32>
    %78 = math.log %77 : vector<16x1xf32>
    %79 = arith.addf %78, %72 : vector<16x1xf32>
    %80 = vector.broadcast %79 : vector<16x1xf32> to vector<16x128xf32>
    %81 = arith.subf %33, %80 : vector<16x128xf32>
    %82 = arith.select %39, %56, %29 : vector<16x128xi1>, vector<16x128xf32>
    %cst_31 = arith.constant 0.000000e+00 : f32
    %83 = vector.broadcast %cst_31 : f32 to vector<16x128xf32>
    %84 = arith.maximumf %33, %83 : vector<16x128xf32>
    %85 = arith.select %41, %84, %82 : vector<16x128xi1>, vector<16x128xf32>
    %86 = vector.shape_cast %68 : vector<16x1xf32> to vector<16x1xf32>
    %87 = vector.broadcast %86 : vector<16x1xf32> to vector<16x128xf32>
    %88 = arith.select %43, %87, %85 : vector<16x128xi1>, vector<16x128xf32>
    %89 = arith.select %48, %81, %88 : vector<16x128xi1>, vector<16x128xf32>
    %c0_32 = arith.constant 0 : index
    %c0_33 = arith.constant 0 : index
    %90 = vector.load %arg4[%c0_32, %c0_33] : memref<16x128xf32, #tpu.memory_space<vmem>>, vector<16x128xf32>
    tpu.vector_store %arg4[%c0_32, %c0_33], %89 {strides = array<i32>} : memref<16x128xf32, #tpu.memory_space<vmem>>, vector<16x128xf32>,
    return
  }
  func.func @transform_0(%arg0: i32) -> (i32, i32) {
    %c0_i32 = arith.constant 0 : i32
    %c0_i32_0 = arith.constant 0 : i32
    return %arg0, %c0_i32 : i32, i32
  }
  func.func @transform_1(%arg0: i32) -> (i32, i32) {
    %c0_i32 = arith.constant 0 : i32
    %c0_i32_0 = arith.constant 0 : i32
    %c0_i32_1 = arith.constant 0 : i32
    return %c0_i32, %c0_i32_0 : i32, i32
  }
  func.func @transform_2(%arg0: i32) -> (i32, i32) {
    %c0_i32 = arith.constant 0 : i32
    %c0_i32_0 = arith.constant 0 : i32
    %c0_i32_1 = arith.constant 0 : i32
    return %c0_i32, %c0_i32_0 : i32, i32
  }
  func.func @transform_3(%arg0: i32) -> (i32, i32) {
    %c0_i32 = arith.constant 0 : i32
    %c0_i32_0 = arith.constant 0 : i32
    return %arg0, %c0_i32 : i32, i32
  }
}

</mosaic_0001>

<bundles_post_ra>
// kernel: tpu_custom_call.1
= control target key start
LH: loop header
LB: loop body
LE: loop exit
PB: predicated region body
PF: predicated region fallthrough
CT: control target
= control target key end

     0   :  { %8 = vsyncpa [#allocation3], 0  ;;  %s1247_s0 = inlined_call_operand.hbm [shape: f32[16,128], index: 0, kind: input, shape index: {}]   ;;  %s1248_s1 = inlined_call_operand.hbm [shape: bf16[640,128], index: 1, kind: input, shape index: {}]   ;;  %s1249_s2 = inlined_call_operand.hbm [shape: f32[8,128], index: 2, kind: input, shape index: {}]   ;;  %s1250_s3 = inlined_call_operand.hbm [shape: f32[16,128], index: 3, kind: output, shape index: {}]  }
   0x1   :  { %9 = vsyncpa [#allocation6], 0 }
   0x2   :  { %10 = vsyncpa [#allocation4], 0  ;;  %s1053_s12 = smov [#allocation5]   ;;  %s959_s16 = scalar_lea.hbm %s1248_s1, 5120 }
   0x3   :  { %s28_s13 = sshll.u32 %s1053_s12, 4  ;;  %p960_p0 = scmp.ne.s32.totalorder %s1248_s1, %s959_s16  ;;  %s29_s13 = int_to_ptr.vmem [resolvable:$true] %s28_s13 }
   0x4   :  { %p963_p1 = scmp.lt.u32.totalorder %s959_s16, %s1248_s1 }
   0x6   :  { %p965_p2 = pnand %p963_p1, %p960_p0 }
   0x8   :  { %968 = shalt.err (!%p965_p2)
}
   0x9   :  { %s969_s21 = scalar_lea.vmem %s29_s13, 5120  ;;  %p974_p4 = scmp.lt.s32.totalorder %s29_s13, %s29_s13 }
   0xa   :  { %p970_p3 = scmp.ne.s32.totalorder %s29_s13, %s969_s21  ;;  %p975_p5 = scmp.lt.s32.totalorder %s969_s21, %s969_s21 }
   0xc   :  { %p976_p6 = por %p975_p5, %p974_p4 }
   0xe   :  { %p977_p7 = pnand %p976_p6, %p970_p3 }
  0x10   :  { %980 = shalt.err (!%p977_p7)
}
  0x11   :  { %s1054_s22 = smov 64   ;;  %s1055_s23 = smov 4  }
  0x12   :  { %34 = dma.hbm_to_vmem [thread:$0]  %s1248_s1, 5120, %s29_s13, [#allocation6], %s1054_s22, %s1054_s22, %s1055_s23  }
  0x13   :  { %s1056_s26 = smov [#allocation2]   ;;  %s981_s30 = scalar_lea.hbm %s1247_s0, 256 }
  0x14   :  { %s16_s27 = sshll.u32 %s1056_s26, 4  ;;  %p982_p8 = scmp.ne.s32.totalorder %s1247_s0, %s981_s30  ;;  %s17_s27 = int_to_ptr.vmem [resolvable:$true] %s16_s27 }
  0x15   :  { %p985_p9 = scmp.lt.u32.totalorder %s981_s30, %s1247_s0 }
  0x17   :  { %p987_p10 = pnand %p985_p9, %p982_p8 }
  0x19   :  { %990 = shalt.err (!%p987_p10)
}
  0x1a   :  { %s991_s8 = scalar_lea.vmem %s17_s27, 256  ;;  %p996_p12 = scmp.lt.s32.totalorder %s17_s27, %s17_s27 }
  0x1b   :  { %p992_p11 = scmp.ne.s32.totalorder %s17_s27, %s991_s8  ;;  %p997_p13 = scmp.lt.s32.totalorder %s991_s8, %s991_s8 }
  0x1d   :  { %p998_p0 = por %p997_p13, %p996_p12 }
  0x1f   :  { %p999_p1 = pnand %p998_p0, %p992_p11 }
  0x21   :  { %1002 = shalt.err (!%p999_p1)
}
  0x22   :  { %s1057_s1 = smov 128   ;;  %s1058_s9 = smov 8  }
  0x23   :  { %22 = dma.hbm_to_vmem [thread:$0]  %s1247_s0, 256, %s17_s27, [#allocation3], %s1057_s1, %s1057_s1, %s1058_s9  }
  0x24   :  { %s1059_s12 = smov [#allocation7]   ;;  %s1003_s16 = scalar_lea.hbm %s1249_s2, 128 }
  0x25   :  { %s41_s13 = sshll.u32 %s1059_s12, 4  ;;  %p1004_p2 = scmp.ne.s32.totalorder %s1249_s2, %s1003_s16  ;;  %s42_s13 = int_to_ptr.vmem [resolvable:$true] %s41_s13 }
  0x26   :  { %p1007_p3 = scmp.lt.u32.totalorder %s1003_s16, %s1249_s2 }
  0x28   :  { %p1009_p4 = pnand %p1007_p3, %p1004_p2 }
  0x2a   :  { %1012 = shalt.err (!%p1009_p4)
}
  0x2b   :  { %s1013_s21 = scalar_lea.vmem %s42_s13, 128  ;;  %p1018_p6 = scmp.lt.s32.totalorder %s42_s13, %s42_s13 }
  0x2c   :  { %p1014_p5 = scmp.ne.s32.totalorder %s42_s13, %s1013_s21  ;;  %p1019_p7 = scmp.lt.s32.totalorder %s1013_s21, %s1013_s21 }
  0x2e   :  { %p1020_p8 = por %p1019_p7, %p1018_p6 }
  0x30   :  { %p1021_p9 = pnand %p1020_p8, %p1014_p5 }
  0x32   :  { %1024 = shalt.err (!%p1021_p9)
}
  0x33   :  { %44 = dma.hbm_to_vmem [thread:$0]  %s1249_s2, 128, %s42_s13, [#allocation6]  }
  0x34   :  { %1047 = dma.done.wait [#allocation3], 256  }
  0x35   :  { %1048 = vsyncadd [#allocation3], 4294967040 }
  0x36   :  { %1049 = dma.done.wait [#allocation6], 5248  }
  0x37   :  { %1050 = vsyncadd [#allocation6], 4294962048  ;;  %v1060_v0 = vmov 0.0   ;;  %vm1061_vm0 = vmmov 0   ;;  %v907_v1 = vld [vmem:[#allocation5] sm:$0xff]   ;;  %v908_v2 = vld [vmem:[#allocation5 + $0x8] sm:$0xff]  }
  0x38   :  { %817 = vmatprep.subr.bf16.mxu1 %v1060_v0  ;;  %833 = vmatprep.mubr.msk.bf16.mxu1 %vm1061_vm0, %v1060_v0  ;;  %v909_v3 = vld [vmem:[#allocation5 + $0x10] sm:$0xff]   ;;  %v910_v4 = vld [vmem:[#allocation5 + $0x18] sm:$0xff]   ;;  %v915_v5 = vld [vmem:[#allocation5 + $0x40] sm:$0xff]   ;;  %s1062_s2 = smov [#allocation8]  }
  0x39   :  { %797 = vmatprep.subr.bf16.mxu0 %v1060_v0  ;;  %813 = vmatprep.mubr.msk.bf16.mxu0 %vm1061_vm0, %v1060_v0  ;;  %v916_v6 = vld [vmem:[#allocation5 + $0x48] sm:$0xff]   ;;  %v911_v7 = vld [vmem:[#allocation5 + $0x20] sm:$0xff]   ;;  %v917_v8 = vld [vmem:[#allocation5 + $0x50] sm:$0xff]   ;;  %s691_s23 = sshll.u32 %s1062_s2, 4  ;;  %s692_s23 = int_to_ptr.vmem [resolvable:$true] %s691_s23 }
  0x3a   :  { %818 = vmatpush3.bf16.msra.mxu1 %v907_v1  ;;  %798 = vmatpush3.bf16.msra.mxu0 %v915_v5  ;;  %v912_v9 = vld [vmem:[#allocation5 + $0x28] sm:$0xff]   ;;  %v918_v10 = vld [vmem:[#allocation5 + $0x58] sm:$0xff]   ;;  %v913_v11 = vld [vmem:[#allocation5 + $0x30] sm:$0xff]   ;;  %s1025_s24 = scalar_lea.vmem %s692_s23, 256  ;;  %p1030_p11 = scmp.lt.s32.totalorder %s692_s23, %s692_s23 }
  0x3b   :  { %819 = vmatprep.subr.bf16.mxu1 %v1060_v0  ;;  %799 = vmatprep.subr.bf16.mxu0 %v1060_v0  ;;  %v919_v12 = vld [vmem:[#allocation5 + $0x60] sm:$0xff]   ;;  %v914_v13 = vld [vmem:[#allocation5 + $0x38] sm:$0xff]   ;;  %v1137_v14 = vld [vmem:[#allocation2] sm:$0xff]  ;;  %p1026_p10 = scmp.ne.s32.totalorder %s692_s23, %s1025_s24  ;;  %p1031_p12 = scmp.lt.s32.totalorder %s1025_s24, %s1025_s24 }
  0x3c   :  { %v1139_v15 = vld [vmem:[#allocation2 + $0x8] sm:$0xff]  ;;  %v920_v16 = vld [vmem:[#allocation5 + $0x68] sm:$0xff]   ;;  %v921_v18 = vld [vmem:[#allocation5 + $0x70] sm:$0xff]  }
  0x3d   :  { %v57_v17 = vpack.c.bf16 %v1139_v15, %v1137_v14  ;;  %v922_v19 = vld [vmem:[#allocation5 + $0x78] sm:$0xff]   ;;  %v923_v20 = vld [vmem:[#allocation5 + $0x80] sm:$0xff]   ;;  %v924_v21 = vld [vmem:[#allocation5 + $0x88] sm:$0xff]   ;;  %p1032_p13 = por %p1031_p12, %p1030_p11 }
  0x3e   :  { %820 = vmatpush3.bf16.msra.mxu1 %v908_v2  ;;  %800 = vmatpush3.bf16.msra.mxu0 %v916_v6  ;;  %v925_v22 = vld [vmem:[#allocation5 + $0x90] sm:$0xff]   ;;  %v926_v23 = vld [vmem:[#allocation5 + $0x98] sm:$0xff]   ;;  %v927_v24 = vld [vmem:[#allocation5 + $0xa0] sm:$0xff]  }
  0x3f   :  { %821 = vmatprep.subr.bf16.mxu1 %v1060_v0  ;;  %801 = vmatprep.subr.bf16.mxu0 %v1060_v0  ;;  %v928_v25 = vld [vmem:[#allocation5 + $0xa8] sm:$0xff]   ;;  %v929_v26 = vld [vmem:[#allocation5 + $0xb0] sm:$0xff]   ;;  %v930_v27 = vld [vmem:[#allocation5 + $0xb8] sm:$0xff]   ;;  %p1033_p0 = pnand %p1032_p13, %p1026_p10 }
  0x40   :  { %v931_v28 = vld [vmem:[#allocation5 + $0xc0] sm:$0xff]   ;;  %v932_v29 = vld [vmem:[#allocation5 + $0xc8] sm:$0xff]   ;;  %v933_v30 = vld [vmem:[#allocation5 + $0xd0] sm:$0xff]  }
  0x41   :  { %v934_v31 = vld [vmem:[#allocation5 + $0xd8] sm:$0xff]   ;;  %v935_v32 = vld [vmem:[#allocation5 + $0xe0] sm:$0xff]   ;;  %v936_v33 = vld [vmem:[#allocation5 + $0xe8] sm:$0xff]  }
  0x42   :  { %822 = vmatpush3.bf16.msra.mxu1 %v909_v3  ;;  %802 = vmatpush3.bf16.msra.mxu0 %v917_v8  ;;  %v712_v34 = vld [vmem:[#allocation7] ss:$0 sm:$0xff]  ;;  %v937_v48 = vld [vmem:[#allocation5 + $0xf0] sm:$0xff]   ;;  %v938_v49 = vld [vmem:[#allocation5 + $0xf8] sm:$0xff]  }
  0x43   :  { %823 = vmatprep.subr.bf16.mxu1 %v1060_v0  ;;  %803 = vmatprep.subr.bf16.mxu0 %v1060_v0  ;;  %v939_v50 = vld [vmem:[#allocation5 + $0x100] sm:$0xff]   ;;  %v940_v51 = vld [vmem:[#allocation5 + $0x108] sm:$0xff]   ;;  %v941_v52 = vld [vmem:[#allocation5 + $0x110] sm:$0xff]  }
  0x44   :  { %v942_v53 = vld [vmem:[#allocation5 + $0x118] sm:$0xff]   ;;  %v943_v54 = vld [vmem:[#allocation5 + $0x120] sm:$0xff]   ;;  %v944_v2 = vld [vmem:[#allocation5 + $0x128] sm:$0xff]  }
  0x45   :  { %v721_v55 = vld [vmem:[#allocation7 + $0x1] ss:$0 sm:$0xff]  ;;  %v945_v3 = vld [vmem:[#allocation5 + $0x130] sm:$0xff]   ;;  %v738_v5 = vld [vmem:[#allocation7 + $0x2] ss:$0 sm:$0xff] }
  0x46   :  { %824 = vmatpush3.bf16.msra.mxu1 %v910_v4  ;;  %804 = vmatpush3.bf16.msra.mxu0 %v918_v10  ;;  %v946_v4 = vld [vmem:[#allocation5 + $0x138] sm:$0xff]  }
  0x47   :  { %825 = vmatprep.subr.bf16.mxu1 %v1060_v0  ;;  %805 = vmatprep.subr.bf16.mxu0 %v1060_v0 }
  0x4a   :  { %826 = vmatpush3.bf16.msra.mxu1 %v911_v7  ;;  %806 = vmatpush3.bf16.msra.mxu0 %v919_v12 }
  0x4b   :  { %827 = vmatprep.subr.bf16.mxu1 %v1060_v0  ;;  %807 = vmatprep.subr.bf16.mxu0 %v1060_v0 }
  0x4e   :  { %828 = vmatpush3.bf16.msra.mxu1 %v912_v9  ;;  %808 = vmatpush3.bf16.msra.mxu0 %v920_v16 }
  0x4f   :  { %829 = vmatprep.subr.bf16.mxu1 %v1060_v0  ;;  %809 = vmatprep.subr.bf16.mxu0 %v1060_v0 }
  0x52   :  { %830 = vmatpush3.bf16.msra.mxu1 %v913_v11  ;;  %810 = vmatpush3.bf16.msra.mxu0 %v921_v18 }
  0x53   :  { %831 = vmatprep.subr.bf16.mxu1 %v1060_v0  ;;  %811 = vmatprep.subr.bf16.mxu0 %v1060_v0 }
  0x56   :  { %832 = vmatpush3.bf16.msra.mxu1 %v914_v13  ;;  %812 = vmatpush3.bf16.msra.mxu0 %v922_v19  ;;  %v614_v19 = vlaneseq }
  0x57   :  { %857 = vmatprep.subr.bf16.mxu1 %v1060_v0  ;;  %837 = vmatprep.subr.bf16.mxu0 %v1060_v0 }
  0x59   :  { %834 = vmatmul.mubr.bf16.vlgmr.msra.gmra.mrb[0].mxu1 %v57_v17  ;;  %814 = vmatmul.mubr.bf16.vlgmr.msra.gmra.mrb[0].mxu0 %v57_v17 }
  0x5a   :  { %873 = vmatprep.mubr.msk.bf16.mxu1 %vm1061_vm0, %v1060_v0  ;;  %838 = vmatpush3.bf16.msra.mxu0 %v923_v20  ;;  %v1178_v20 = vand.u32 127, %v614_v19 }
  0x5b   :  { %853 = vmatprep.mubr.msk.bf16.mxu0 %vm1061_vm0, %v1060_v0  ;;  %839 = vmatprep.subr.bf16.mxu0 %v1060_v0 }
  0x5c   :  { %858 = vmatpush3.bf16.msra.mxu1 %v931_v28  ;;  %vm621_vm1 = vcmp.ge.s32.totalorder %v1178_v20, 36  ;;  %vm622_vm2 = vcmp.lt.s32.totalorder %v1178_v20, 46  ;;  %vm616_vm4 = vcmp.ge.s32.totalorder %v1178_v20, 32  ;;  %vm617_vm5 = vcmp.lt.s32.totalorder %v1178_v20, 34 }
  0x5d   :  { %859 = vmatprep.subr.bf16.mxu1 %v1060_v0  ;;  %vm1182_vm3 = vmand %vm621_vm1, %vm622_vm2  ;;  %vm619_vm7 = vcmp.eq.s32.totalorder %v1178_v20, 34  ;;  %vm620_vm8 = vcmp.eq.s32.totalorder %v1178_v20, 35 }
  0x5e   :  { %840 = vmatpush3.bf16.msra.mxu0 %v924_v21  ;;  %vm1202_vm6 = vmand %vm616_vm4, %vm617_vm5 }
  0x5f   :  { %841 = vmatprep.subr.bf16.mxu0 %v1060_v0 }
  0x60   :  { %860 = vmatpush3.bf16.msra.mxu1 %v932_v29 }
  0x61   :  { %861 = vmatprep.subr.bf16.mxu1 %v1060_v0 }
  0x62   :  { %842 = vmatpush3.bf16.msra.mxu0 %v925_v22 }
  0x63   :  { %843 = vmatprep.subr.bf16.mxu0 %v1060_v0 }
  0x64   :  { %862 = vmatpush3.bf16.msra.mxu1 %v933_v30  ;;  %v626_v30 = vmul.f32 0.2, %v1137_v14 }
  0x65   :  { %863 = vmatprep.subr.bf16.mxu1 %v1060_v0 }
  0x66   :  { %844 = vmatpush3.bf16.msra.mxu0 %v926_v23 }
  0x67   :  { %845 = vmatprep.subr.bf16.mxu0 %v1060_v0 }
  0x68   :  { %864 = vmatpush3.bf16.msra.mxu1 %v934_v31  ;;  %v627_v31 = vmul.f32 0.2, %v1139_v15 }
  0x69   :  { %865 = vmatprep.subr.bf16.mxu1 %v1060_v0 }
  0x6a   :  { %846 = vmatpush3.bf16.msra.mxu0 %v927_v24 }
  0x6b   :  { %847 = vmatprep.subr.bf16.mxu0 %v1060_v0 }
  0x6c   :  { %866 = vmatpush3.bf16.msra.mxu1 %v935_v32 }
  0x6d   :  { %867 = vmatprep.subr.bf16.mxu1 %v1060_v0 }
  0x6e   :  { %848 = vmatpush3.bf16.msra.mxu0 %v928_v25 }
  0x6f   :  { %849 = vmatprep.subr.bf16.mxu0 %v1060_v0 }
  0x70   :  { %868 = vmatpush3.bf16.msra.mxu1 %v936_v33 }
  0x71   :  { %869 = vmatprep.subr.bf16.mxu1 %v1060_v0 }
  0x72   :  { %850 = vmatpush3.bf16.msra.mxu0 %v929_v26 }
  0x73   :  { %851 = vmatprep.subr.bf16.mxu0 %v1060_v0 }
  0x74   :  { %870 = vmatpush3.bf16.msra.mxu1 %v937_v48 }
  0x75   :  { %871 = vmatprep.subr.bf16.mxu1 %v1060_v0 }
  0x76   :  { %852 = vmatpush3.bf16.msra.mxu0 %v930_v27 }
  0x77   :  { %877 = vmatprep.subr.bf16.mxu0 %v1060_v0 }
  0x78   :  { %872 = vmatpush3.bf16.msra.mxu1 %v938_v49 }
 0x12c   :  { %v317_v35 = vpop.f32.mrb[0].mxu1  ;;  %v224_v44 = vpop.f32.mrb[0].mxu0 }
 0x12d   :  { %v318_v36 = vadd.f32 %v712_v34, %v317_v35  ;;  %v835_v37 = vpop.f32.mrb[1].mxu1  ;;  %v815_v45 = vpop.f32.mrb[1].mxu0 }
 0x12e   :  { %v320_v38 = vpop.f32.mrb[2].mxu1  ;;  %v227_v46 = vpop.f32.mrb[2].mxu0 }
 0x12f   :  { %v321_v39 = vadd.f32 %v712_v34, %v320_v38  ;;  %v836_v40 = vpop.f32.mrb[3].mxu1  ;;  %v324_v41 = vmax.f32 %v318_v36, 0.0  ;;  %v816_v47 = vpop.f32.mrb[3].mxu0 }
 0x131   :  { %v325_v42 = vmax.f32 %v321_v39, 0.0 }
 0x133   :  { %v326_v43 = vpack.c.bf16 %v325_v42, %v324_v41 }
 0x135   :  { %854 = vmatmul.mubr.bf16.vlgmr.msra.gmra.mrb[4].mxu0 %v326_v43 }
 0x136   :  { %893 = vmatprep.mubr.msk.bf16.mxu0 %vm1061_vm0, %v1060_v0  ;;  %878 = vmatpush3.bf16.msra.mxu0 %v939_v50 }
 0x137   :  { %879 = vmatprep.subr.bf16.mxu0 %v1060_v0 }
 0x13a   :  { %880 = vmatpush3.bf16.msra.mxu0 %v940_v51 }
 0x13b   :  { %881 = vmatprep.subr.bf16.mxu0 %v1060_v0 }
 0x13e   :  { %882 = vmatpush3.bf16.msra.mxu0 %v941_v52 }
 0x13f   :  { %883 = vmatprep.subr.bf16.mxu0 %v1060_v0 }
 0x142   :  { %884 = vmatpush3.bf16.msra.mxu0 %v942_v53 }
 0x143   :  { %885 = vmatprep.subr.bf16.mxu0 %v1060_v0 }
 0x146   :  { %886 = vmatpush3.bf16.msra.mxu0 %v943_v54 }
 0x147   :  { %887 = vmatprep.subr.bf16.mxu0 %v1060_v0 }
 0x14a   :  { %888 = vmatpush3.bf16.msra.mxu0 %v944_v2 }
 0x14b   :  { %889 = vmatprep.subr.bf16.mxu0 %v1060_v0 }
 0x14e   :  { %890 = vmatpush3.bf16.msra.mxu0 %v945_v3 }
 0x14f   :  { %891 = vmatprep.subr.bf16.mxu0 %v1060_v0  ;;  %v739_v0 = vld [vmem:[#allocation7 + $0x3] ss:$0 sm:$0xff] }
 0x152   :  { %892 = vmatpush3.bf16.msra.mxu0 %v946_v4 }
 0x208   :  { %v413_v56 = vpop.f32.mrb[4].mxu0 }
 0x209   :  { %v414_v57 = vadd.f32 %v721_v55, %v413_v56  ;;  %v855_v58 = vpop.f32.mrb[5].mxu0 }
 0x20a   :  { %v416_v59 = vpop.f32.mrb[6].mxu0 }
 0x20b   :  { %v417_v60 = vadd.f32 %v721_v55, %v416_v59  ;;  %v856_v61 = vpop.f32.mrb[7].mxu0  ;;  %v420_v62 = vmax.f32 %v414_v57, 0.0 }
 0x20d   :  { %v421_v63 = vmax.f32 %v417_v60, 0.0 }
 0x20f   :  { %v422_v1 = vpack.c.bf16 %v421_v63, %v420_v62 }
 0x211   :  { %874 = vmatmul.mubr.bf16.vlgmr.msra.gmra.mrb[4].mxu1 %v422_v1 }
 0x2e4   :  { %v505_v6 = vpop.f32.mrb[4].mxu1 }
 0x2e5   :  { %v506_v7 = vadd.f32 %v505_v6, %v224_v44  ;;  %v875_v8 = vpop.f32.mrb[5].mxu1 }
 0x2e6   :  { %v508_v9 = vpop.f32.mrb[6].mxu1 }
 0x2e7   :  { %v516_v10 = vadd.f32 %v738_v5, %v506_v7  ;;  %v509_v11 = vadd.f32 %v508_v9, %v227_v46  ;;  %v876_v12 = vpop.f32.mrb[7].mxu1 }
 0x2e9   :  { %v517_v13 = vadd.f32 %v738_v5, %v509_v11  ;;  %v518_v16 = vmax.f32 %v516_v10, 0.0 }
 0x2eb   :  { %v519_v17 = vmax.f32 %v517_v13, 0.0 }
 0x2ed   :  { %v520_v18 = vpack.c.bf16 %v519_v17, %v518_v16 }
 0x2ef   :  { %894 = vmatmul.mubr.bf16.vlgmr.msra.gmra.mrb[8].mxu0 %v520_v18 }
 0x3c2   :  { %v607_v21 = vpop.f32.mrb[8].mxu0 }
 0x3c3   :  { %v1186_v23 = vadd.f32 %v739_v0, %v607_v21  ;;  %v895_v24 = vpop.f32.mrb[9].mxu0 }
 0x3c4   :  { %v610_v25 = vpop.f32.mrb[10].mxu0 }
 0x3c5   :  { %947 = vtanh.f32 %v1186_v23  ;;  %v1189_v26 = vadd.f32 %v739_v0, %v610_v25  ;;  %v896_v27 = vpop.f32.mrb[11].mxu0  ;;  %v650_v28 = vsel %vm1182_vm3, %v1186_v23, -inf  ;;  %v676_v63 = vmax.f32 %v1186_v23, 0.0 }
 0x3c6   :  { %652 = vmax.xlane.f32.xlu0 %v650_v28 }
 0x3c7   :  { %949 = vtanh.f32 %v1189_v26  ;;  %v651_v29 = vsel %vm1182_vm3, %v1189_v26, -inf  ;;  %v677_v9 = vmax.f32 %v1189_v26, 0.0 }
 0x3ca   :  { %654 = vmax.xlane.f32.xlu0 %v651_v29 }
 0x3cf   :  { %v948_v32 = vpop.eup %947 }
 0x3d0   :  { %v628_v33 = vadd.f32 %v948_v32, %v626_v30 }
 0x3d1   :  { %v950_v34 = vpop.eup %949 }
 0x3d2   :  { %v748_v36 = vclamps-f32 %v628_v33, 1.0  ;;  %v629_v37 = vadd.f32 %v950_v34, %v627_v31 }
 0x3d4   :  { %v634_v38 = vsub.f32 %v748_v36, %v948_v32  ;;  %v749_v39 = vclamps-f32 %v629_v37, 1.0  ;;  %v674_v14 = vsel %vm1202_vm6, %v748_v36, %v518_v16 }
 0x3d5   :  { %v678_v4 = vsel %vm619_vm7, %v676_v63, %v674_v14 }
 0x3d6   :  { %v636_v40 = vmul.f32 5.0, %v634_v38  ;;  %v635_v15 = vsub.f32 %v749_v39, %v950_v34  ;;  %v675_v41 = vsel %vm1202_vm6, %v749_v39, %v519_v17 }
 0x3d7   :  { %v679_v13 = vsel %vm619_vm7, %v677_v9, %v675_v41 }
 0x3d8   :  { %v638_v42 = vmul.f32 -0.5, %v636_v40  ;;  %v637_v43 = vmul.f32 5.0, %v635_v15 }
 0x3da   :  { %v640_v44 = vmul.f32 %v638_v42, %v636_v40  ;;  %v639_v45 = vmul.f32 -0.5, %v637_v43 }
 0x3dc   :  { %v750_v46 = vadd.f32 0.69049937, %v640_v44  ;;  %v641_v47 = vmul.f32 %v639_v45, %v637_v43 }
 0x3de   :  { %v644_v48 = vsel %vm1202_vm6, %v750_v46, 0.0  ;;  %v751_v49 = vadd.f32 0.69049937, %v641_v47 }
 0x3df   :  { %646 = vadd.xlane.f32.xlu0 %v644_v48 }
 0x3e0   :  { %v645_v50 = vsel %vm1202_vm6, %v751_v49, 0.0 }
 0x453   :  { %v653_v51 = vpop.xlane.xlu0 %652 }
 0x454   :  { %v656_v52 = vsub.f32 %v650_v28, %v653_v51 }
 0x456   :  { %v658_v53 = vmul.f32 1.442695, %v656_v52 }
 0x457   :  { %v655_v54 = vpop.xlane.xlu0 %654 }
 0x458   :  { %v657_v55 = vsub.f32 %v651_v29, %v655_v54  ;;  %951 = vpow2.f32 %v658_v53 }
 0x45a   :  { %v660_v56 = vmul.f32 1.442695, %v657_v55 }
 0x45c   :  { %953 = vpow2.f32 %v660_v56 }
 0x462   :  { %v952_v57 = vpop.eup %951 }
 0x463   :  { %662 = vadd.xlane.f32.xlu1 %v952_v57 }
 0x466   :  { %v954_v58 = vpop.eup %953 }
 0x467   :  { %664 = vadd.xlane.f32.xlu1 %v954_v58 }
 0x46b   :  { %648 = vadd.xlane.f32.xlu1 %v645_v50 }
 0x46c   :  { %v647_v1 = vpop.xlane.xlu0 %646 }
 0x46d   :  { %v680_v7 = vsel %vm620_vm8, %v647_v1, %v678_v4 }
 0x4f0   :  { %v663_v59 = vpop.xlane.xlu1 %662 }
 0x4f1   :  { %955 = vlog2.f32 %v663_v59 }
 0x4f4   :  { %v665_v60 = vpop.xlane.xlu1 %664 }
 0x4f5   :  { %957 = vlog2.f32 %v665_v60 }
 0x4f8   :  { %v649_v10 = vpop.xlane.xlu1 %648 }
 0x4f9   :  { %v681_v16 = vsel %vm620_vm8, %v649_v10, %v679_v13 }
 0x4fb   :  { %v956_v61 = vpop.eup %955 }
 0x4fc   :  { %v667_v62 = vmul.f32 0.6931472, %v956_v61 }
 0x4fe   :  { %v670_v2 = vadd.f32 %v667_v62, %v653_v51 }
 0x4ff   :  { %v958_v3 = vpop.eup %957 }
 0x500   :  { %v672_v5 = vsub.f32 %v1186_v23, %v670_v2  ;;  %v669_v6 = vmul.f32 0.6931472, %v958_v3 }
 0x502   :  { %v671_v8 = vadd.f32 %v669_v6, %v655_v54  ;;  %v682_v11 = vsel %vm1182_vm3, %v672_v5, %v680_v7 }
 0x503   :  { %684 = vst [vmem:[#allocation8] sm:$0xff] %v682_v11 }
 0x504   :  { %v673_v12 = vsub.f32 %v1189_v26, %v671_v8 }
 0x506   :  { %v683_v17 = vsel %vm1182_vm3, %v673_v12, %v681_v16 }
 0x507   :  { %685 = vst [vmem:[#allocation8 + $0x8] sm:$0xff] %v683_v17 }
 0x508   :  { %1036 = shalt.err (!%p1033_p0)
}
 0x509   :  { %s1037_s27 = scalar_lea.hbm %s1250_s3, 256 }
 0x50a   :  { %p1038_p1 = scmp.ne.s32.totalorder %s1250_s3, %s1037_s27  ;;  %p1041_p2 = scmp.lt.u32.totalorder %s1037_s27, %s1250_s3 }
 0x50c   :  { %p1043_p3 = pnand %p1041_p2, %p1038_p1 }
 0x50e   :  { %1046 = shalt.err (!%p1043_p3)
}
 0x50f   :  { %697 = dma.vmem_to_hbm [thread:$0]  %s692_s23, 256, %s1250_s3, [#allocation4], %s1057_s1, %s1057_s1, %s1058_s9  }
 0x510   :  { %1051 = dma.done.wait [#allocation4], 256  }
 0x511   :  { %1052 = vsyncadd [#allocation4], 4294967040 }
 0x512   :  { %701 = vsyncpa [#allocation3], 1 }
 0x513   :  { %702 = vsyncpa [#allocation6], 1 }
 0x514   :  { %703 = vsyncpa [#allocation4], 1 }

</bundles_post_ra>
